<compile_context>
chip_gen: v6e
topology: v6e:2x2x1
jax: 0.10.0
libtpu: 0.0.40
codegen_flags: <defaults>
</compile_context>

<pallas_src>
import functools

import jax
import jax.numpy as jnp
from jax import lax
from jax.experimental import pallas as pl
from jax.experimental.pallas import tpu as pltpu


def _proj_kernel(h_ref, wf_ref, bf_ref, dst_ref, src_ref):
    """Fused projection proj = h @ [W_A|W_E|W_B|W_D] + bias, split into the
    destination slabs [Ah|Eh] and source slabs [Bh|Dh] (compute dtype)."""
    dout2 = dst_ref.shape[1]
    proj = jnp.dot(h_ref[...], wf_ref[...],
                   preferred_element_type=jnp.float32) + bf_ref[...]
    dst_ref[...] = proj[:, :dout2].astype(dst_ref.dtype)
    src_ref[...] = proj[:, dout2:].astype(src_ref.dtype)


def _agg_kernel(dst_ref, src_ref, adj_ref, hnew_ref, stats_ref,
                ssh_ref, ss_ref, *, approx_recip):
    """One (v-tile, u-chunk) grid step of the gated aggregation.

    Grid dim 0 (v tiles) is "parallel"; grid dim 1 (u chunks) is the
    reduction: sum_sigma_h / sum_sigma accumulate in f32 VMEM scratch, and
    h_new plus per-tile BN partial statistics are written on the last u step.
    """
    j = pl.program_id(1)
    dout = hnew_ref.shape[1]

    @pl.when(j == 0)
    def _():
        ssh_ref[...] = jnp.zeros_like(ssh_ref)
        ss_ref[...] = jnp.zeros_like(ss_ref)

    dst = dst_ref[...]                       # [tile_v, 2*dout]  compute dtype
    src = src_ref[...]                       # [tile_u, 2*dout]
    Eh_v = dst[:, dout:]                     # [tile_v, D]
    Bh_u = src[:, :dout]                     # [tile_u, D]
    Dh_u = src[:, dout:]                     # [tile_u, D]
    adj = adj_ref[...]                       # [tile_v, tile_u] exact 0/1 mask

    # sigma[v, u, d] = sigmoid(Dh[u, d] + Eh[v, d]) for edge u -> v.
    # Bounded [tile_v, tile_u, D] working set; f32 accumulation of both sums.
    sig = jax.nn.sigmoid(Eh_v[:, None, :] + Dh_u[None, :, :])
    masked = adj[:, :, None] * sig                               # reused twice
    ssh_ref[...] += jnp.sum(masked * Bh_u[None, :, :], axis=1, dtype=jnp.float32)
    ss_ref[...] += jnp.sum(masked, axis=1, dtype=jnp.float32)

    @pl.when(j == pl.num_programs(1) - 1)
    def _():
        Ah_v = dst[:, :dout].astype(jnp.float32)
        inv = pl.reciprocal(ss_ref[...] + 1e-6, approx=approx_recip)
        h_new = Ah_v + ssh_ref[...] * inv
        hnew_ref[...] = h_new
        # Per-tile BatchNorm partial statistics (rows 0: sum, 1: sum of
        # squares), written once per v tile; finalized in the wrapper.
        stats_ref[...] = jnp.zeros_like(stats_ref)
        stats_ref[0:1, :] = jnp.sum(h_new, axis=0, keepdims=True)
        stats_ref[1:2, :] = jnp.sum(h_new * h_new, axis=0, keepdims=True)


def gated_gcn_forward(h, e, adj, params, *, residual=None,
                      compute_dtype=jnp.bfloat16, tile_v=None, tile_u=None,
                      tile_n=None, bn_eps=1e-5, vmem_limit_bytes=None):
    """Forward pass of GatedGCNLayerEdgeFeatOnly (batch_norm=True, dropout=0).

    compute_dtype: bf16 recommended on v6e/v7x (bf16 VPU/EUP/MXU); use f32 on
    v5e.  adj is shipped in the compute dtype.
    """
    N, din = h.shape
    dout = params["wa"].shape[1]
    if residual is None:
        residual = din == dout
    if residual and din != dout:
        raise ValueError("residual requires input_dim == output_dim")

    # Destination tile (parallel axis), source chunk (reduction axis),
    # projection row tile.  Conservative defaults; on 128-MiB VMEM parts
    # (v5e/v6e) raise tile_v/tile_u (and vmem_limit_bytes) for better
    # HBM-roofline utilisation; re-budget for 64 MiB on v7x.
    tile_v = tile_v or (N if N <= 128 else 128)
    tile_u = tile_u or (N if N <= 128 else 128)
    tile_n = tile_n or (N if N <= 256 else 256)
    assert N % tile_v == 0 and N % tile_u == 0 and N % tile_n == 0
    assert tile_u == N or tile_u % 128 == 0       # adj block lane dim
    assert tile_v == N or tile_v % 16 == 0        # sublane dim (bf16-safe)
    n_v, n_u = N // tile_v, N // tile_u

    cdt = jnp.dtype(compute_dtype)
    use_bf16 = cdt == jnp.dtype(jnp.bfloat16)

    # Fuse the four projections into one lane-dense [din, 4*dout] matmul,
    # slab order [A | E | B | D] so dst = [Ah|Eh], src = [Bh|Dh].
    wf = jnp.concatenate([params["wa"], params["we"],
                          params["wb"], params["wd"]], axis=1)
    bf = jnp.concatenate([params["ba"], params["be"],
                          params["bb"], params["bd"]], axis=1).astype(jnp.float32)

    dst_proj, src_proj = pl.pallas_call(
        _proj_kernel,
        grid=(N // tile_n,),
        in_specs=[
            pl.BlockSpec((tile_n, din), lambda i: (i, 0)),
            pl.BlockSpec((din, 4 * dout), lambda i: (0, 0)),
            pl.BlockSpec((1, 4 * dout), lambda i: (0, 0)),
        ],
        out_specs=(
            pl.BlockSpec((tile_n, 2 * dout), lambda i: (i, 0)),
            pl.BlockSpec((tile_n, 2 * dout), lambda i: (i, 0)),
        ),
        out_shape=(
            jax.ShapeDtypeStruct((N, 2 * dout), cdt),
            jax.ShapeDtypeStruct((N, 2 * dout), cdt),
        ),
        compiler_params=pltpu.CompilerParams(
            dimension_semantics=("parallel",),
            vmem_limit_bytes=vmem_limit_bytes),
    )(h.astype(cdt), wf.astype(cdt), bf)

    # adj is an exact 0/1 mask; ship it in the gating compute dtype (bf16 on
    # v6e/v7x halves the only O(N^2) HBM stream).
    # TODO(synk): on v5e an int8 adjacency (exact 0/1, upcast on the VPU)
    # would quarter the adjacency DMA while keeping f32 gating math.
    adj_c = adj.astype(cdt)

    h_new, stats = pl.pallas_call(
        functools.partial(_agg_kernel, approx_recip=use_bf16),
        grid=(n_v, n_u),
        in_specs=[
            pl.BlockSpec((tile_v, 2 * dout), lambda i, j: (i, 0)),   # [Ah|Eh] v tile
            pl.BlockSpec((tile_u, 2 * dout), lambda i, j: (j, 0)),   # [Bh|Dh] u chunk
            pl.BlockSpec((tile_v, tile_u), lambda i, j: (i, j)),     # adj tile
        ],
        out_specs=(
            pl.BlockSpec((tile_v, dout), lambda i, j: (i, 0)),       # h_new v tile
            pl.BlockSpec((8, dout), lambda i, j: (i, 0)),            # per-tile BN stats
        ),
        out_shape=(
            jax.ShapeDtypeStruct((N, dout), jnp.float32),
            jax.ShapeDtypeStruct((n_v * 8, dout), jnp.float32),
        ),
        scratch_shapes=[
            pltpu.VMEM((tile_v, dout), jnp.float32),   # sum_sigma_h accumulator
            pltpu.VMEM((tile_v, dout), jnp.float32),   # sum_sigma accumulator
        ],
        compiler_params=pltpu.CompilerParams(
            dimension_semantics=("parallel", "arbitrary"),
            vmem_limit_bytes=vmem_limit_bytes),
    )(dst_proj, src_proj, adj_c)

    # BatchNorm1d (training-mode batch statistics) + ReLU + residual: tiny,
    # memory-bound elementwise work -> plain XLA (fused), per review.
    st = jnp.sum(stats.reshape(n_v, 8, dout), axis=0)
    mean = st[0] / N
    var = jnp.maximum(st[1] / N - mean * mean, 0.0)   # clamp E[x^2]-E[x]^2
    scale = params["gamma"] * lax.rsqrt(var + bn_eps)
    shift = params["beta"] - mean * scale
    out = jnp.maximum(h_new * scale[None, :] + shift[None, :], 0.0)
    if residual:
        out = out + h
    # TODO(synk): dropout with p > 0 (training) and BatchNorm running-stat
    # updates are not implemented (module used with dropout=0 / batch stats).
    return out, e


def reference_forward(h, e, adj, p, residual=True, bn_eps=1e-5):
    """Pure-JAX f32 reference mirroring the PyTorch/DGL semantics."""
    hp = lax.Precision.HIGHEST
    Ah = jnp.dot(h, p["wa"], precision=hp) + p["ba"]
    Bh = jnp.dot(h, p["wb"], precision=hp) + p["bb"]
    Dh = jnp.dot(h, p["wd"], precision=hp) + p["bd"]
    Eh = jnp.dot(h, p["we"], precision=hp) + p["be"]
    sig = jax.nn.sigmoid(Dh[None, :, :] + Eh[:, None, :])
    adj3 = adj[:, :, None]
    ssh = jnp.sum(adj3 * sig * Bh[None, :, :], axis=1)
    ss = jnp.sum(adj3 * sig, axis=1)
    h_new = Ah + ssh / (ss + 1e-6)
    mean = jnp.mean(h_new, axis=0, keepdims=True)
    var = jnp.mean((h_new - mean) ** 2, axis=0, keepdims=True)
    out = (h_new - mean) / jnp.sqrt(var + bn_eps) * p["gamma"] + p["beta"]
    out = jnp.maximum(out, 0.0)
    if residual:
        out = out + h
    return out, e


def make_params(key, din, dout):
    ks = jax.random.split(key, 8)
    bound = 1.0 / jnp.sqrt(din)
    u = lambda k, shape: jax.random.uniform(k, shape, jnp.float32, -bound, bound)
    return {
        "wa": u(ks[0], (din, dout)), "ba": u(ks[1], (1, dout)),
        "wb": u(ks[2], (din, dout)), "bb": u(ks[3], (1, dout)),
        "wd": u(ks[4], (din, dout)), "bd": u(ks[5], (1, dout)),
        "we": u(ks[6], (din, dout)), "be": u(ks[7], (1, dout)),
        "gamma": jnp.ones((dout,), jnp.float32),    # BatchNorm1d default init
        "beta": jnp.zeros((dout,), jnp.float32),
    }


if __name__ == "__main__":
    N = 256        # nodes  -> 2x2 (v, u) grid with the default 128-tiles
    DIN = 64       # input_dim
    DOUT = 64      # output_dim (== input_dim so residual is active)

    key = jax.random.PRNGKey(0)
    k_h, k_e, k_p = jax.random.split(key, 3)

    h = jax.random.normal(k_h, (N, DIN), jnp.float32)

    # Deterministic directed graph: bidirectional ring  u <-> u+1 (mod N).
    src = jnp.concatenate([jnp.arange(N), (jnp.arange(N) + 1) % N])
    dst = jnp.concatenate([(jnp.arange(N) + 1) % N, jnp.arange(N)])
    adj = jnp.zeros((N, N), jnp.float32).at[dst, src].set(1.0)   # adj[v, u]

    e = jax.random.normal(k_e, (src.shape[0], DOUT), jnp.float32)
    params = make_params(k_p, DIN, DOUT)

    h_ref, _ = reference_forward(h, e, adj, params, residual=True)

    # f32 path: tight structural check.  bf16 path: the recommended perf
    # configuration on v6e/v7x, checked at reduced-precision tolerance.
    for cdt, tol in ((jnp.float32, 3e-2), (jnp.bfloat16, 2e-1)):
        h_out, e_out = gated_gcn_forward(h, e, adj, params, residual=True,
                                         compute_dtype=cdt)
        h_out = jax.block_until_ready(h_out)
        err = float(jnp.max(jnp.abs(h_out - h_ref)))
        assert err < tol, f"{cdt}: max abs err {err} >= {tol}"
        assert e_out.shape == e.shape

    print("KERNEL_OK")
</pallas_src>

<mosaic_0001>
module attributes {stable_mosaic.version = 11 : i64} {
  func.func @_proj_kernel(%arg0: i32, %arg1: memref<256x64xf32, #tpu.memory_space<vmem>>, %arg2: memref<64x256xf32, #tpu.memory_space<vmem>>, %arg3: memref<1x256xf32, #tpu.memory_space<vmem>>, %arg4: memref<256x128xf32, #tpu.memory_space<vmem>>, %arg5: memref<256x128xf32, #tpu.memory_space<vmem>>) attributes {dimension_semantics = [#tpu.dimension_semantics<parallel>], iteration_bounds = array<i64: 1>, scalar_prefetch = 0 : i64, scratch_operands = 0 : i64, tpu.core_type = #tpu.core_type<tc>, window_params = [{transform_indices = @transform_0, window_bounds = array<i64: 256, 64>}, {pipeline_mode = #tpu.pipeline_mode<synchronous>, transform_indices = @transform_1, window_bounds = array<i64: 64, 256>}, {pipeline_mode = #tpu.pipeline_mode<synchronous>, transform_indices = @transform_2, window_bounds = array<i64: 1, 256>}, {transform_indices = @transform_3, window_bounds = array<i64: 256, 128>}, {transform_indices = @transform_4, window_bounds = array<i64: 256, 128>}]} {
    %c0 = arith.constant 0 : index
    %c0_0 = arith.constant 0 : index
    %0 = vector.load %arg1[%c0, %c0_0] : memref<256x64xf32, #tpu.memory_space<vmem>>, vector<256x64xf32>
    %c0_1 = arith.constant 0 : index
    %c0_2 = arith.constant 0 : index
    %1 = vector.load %arg2[%c0_1, %c0_2] : memref<64x256xf32, #tpu.memory_space<vmem>>, vector<64x256xf32>
    %cst = arith.constant dense<0.000000e+00> : vector<256x256xf32>
    %2 = tpu.matmul %0, %1, %cst {dimension_numbers = #tpu.dot_dimension_numbers<[1], [0], [0], [1], [0, 0, 1, 1], [], []>} : vector<256x64xf32>, vector<64x256xf32>, vector<256x256xf32> -> vector<256x256xf32>
    %c0_3 = arith.constant 0 : index
    %c0_4 = arith.constant 0 : index
    %3 = vector.load %arg3[%c0_3, %c0_4] : memref<1x256xf32, #tpu.memory_space<vmem>>, vector<1x256xf32>
    %4 = vector.broadcast %3 : vector<1x256xf32> to vector<256x256xf32>
    %5 = arith.addf %2, %4 : vector<256x256xf32>
    %6 = vector.extract_strided_slice %5 {offsets = [0, 0], sizes = [256, 128], strides = [1, 1]} : vector<256x256xf32> to vector<256x128xf32>
    %c0_5 = arith.constant 0 : index
    %c0_6 = arith.constant 0 : index
    %7 = vector.load %arg4[%c0_5, %c0_6] : memref<256x128xf32, #tpu.memory_space<vmem>>, vector<256x128xf32>
    tpu.vector_store %arg4[%c0_5, %c0_6], %6 {strides = array<i32>} : memref<256x128xf32, #tpu.memory_space<vmem>>, vector<256x128xf32>,
    %8 = vector.extract_strided_slice %5 {offsets = [0, 128], sizes = [256, 128], strides = [1, 1]} : vector<256x256xf32> to vector<256x128xf32>
    %c0_7 = arith.constant 0 : index
    %c0_8 = arith.constant 0 : index
    %9 = vector.load %arg5[%c0_7, %c0_8] : memref<256x128xf32, #tpu.memory_space<vmem>>, vector<256x128xf32>
    tpu.vector_store %arg5[%c0_7, %c0_8], %8 {strides = array<i32>} : memref<256x128xf32, #tpu.memory_space<vmem>>, vector<256x128xf32>,
    return
  }
  func.func @transform_0(%arg0: i32) -> (i32, i32) {
    %c0_i32 = arith.constant 0 : i32
    %c0_i32_0 = arith.constant 0 : i32
    return %arg0, %c0_i32 : i32, i32
  }
  func.func @transform_1(%arg0: i32) -> (i32, i32) {
    %c0_i32 = arith.constant 0 : i32
    %c0_i32_0 = arith.constant 0 : i32
    %c0_i32_1 = arith.constant 0 : i32
    return %c0_i32, %c0_i32_0 : i32, i32
  }
  func.func @transform_2(%arg0: i32) -> (i32, i32) {
    %c0_i32 = arith.constant 0 : i32
    %c0_i32_0 = arith.constant 0 : i32
    %c0_i32_1 = arith.constant 0 : i32
    return %c0_i32, %c0_i32_0 : i32, i32
  }
  func.func @transform_3(%arg0: i32) -> (i32, i32) {
    %c0_i32 = arith.constant 0 : i32
    %c0_i32_0 = arith.constant 0 : i32
    return %arg0, %c0_i32 : i32, i32
  }
  func.func @transform_4(%arg0: i32) -> (i32, i32) {
    %c0_i32 = arith.constant 0 : i32
    %c0_i32_0 = arith.constant 0 : i32
    return %arg0, %c0_i32 : i32, i32
  }
}

</mosaic_0001>

<bundles_post_ra>
// kernel: tpu_custom_call.1
= control target key start
LH: loop header
LB: loop body
LE: loop exit
PB: predicated region body
PF: predicated region fallthrough
CT: control target
= control target key end

     0   :  { %10 = vsyncpa [#allocation3], 0  ;;  %vm78_vm0 = vcmask 523264   ;;  %s940_s0 = inlined_call_operand.vmem [shape: f32[256,64], index: 0, kind: input, shape index: {}]   ;;  %s941_s1 = inlined_call_operand.vmem [shape: f32[64,256], index: 1, kind: input, shape index: {}]   ;;  %s942_s2 = inlined_call_operand.vmem [shape: f32[1,256], index: 2, kind: input, shape index: {}]   ;;  %s943_s3 = inlined_call_operand.hbm [shape: f32[256,128], index: 3, kind: output, shape index: {0}]   ;;  %s944_s4 = inlined_call_operand.hbm [shape: f32[256,128], index: 4, kind: output, shape index: {1}]  }
   0x1   :  { %v65_v0 = vld [vmem:[%s941_s1 + $0x78] sm:$0xff]  ;;  %v64_v1 = vld [vmem:[%s941_s1 + $0x70] sm:$0xff]  ;;  %v63_v2 = vld [vmem:[%s941_s1 + $0x68] sm:$0xff] }
   0x2   :  { %191 = vmatprep.subr.mxu0 %v65_v0  ;;  %560 = vmatprep.subr.mxu1 %v65_v0  ;;  %v62_v3 = vld [vmem:[%s941_s1 + $0x60] sm:$0xff]  ;;  %v61_v4 = vld [vmem:[%s941_s1 + $0x58] sm:$0xff]  ;;  %v60_v5 = vld [vmem:[%s941_s1 + $0x50] sm:$0xff] }
   0x3   :  { %192 = vmatpush1.msra.mxu0 %v64_v1  ;;  %568 = vmatpush1.msra.mxu1 %v64_v1  ;;  %v59_v6 = vld [vmem:[%s941_s1 + $0x48] sm:$0xff]  ;;  %v58_v7 = vld [vmem:[%s941_s1 + $0x40] sm:$0xff]  ;;  %v57_v8 = vld [vmem:[%s941_s1 + $0x38] sm:$0xff] }
   0x4   :  { %193 = vmatprep.subr.mxu0 %v63_v2  ;;  %561 = vmatprep.subr.mxu1 %v63_v2  ;;  %v56_v9 = vld [vmem:[%s941_s1 + $0x30] sm:$0xff]  ;;  %v55_v10 = vld [vmem:[%s941_s1 + $0x28] sm:$0xff]  ;;  %v54_v11 = vld [vmem:[%s941_s1 + $0x20] sm:$0xff] }
   0x5   :  { %194 = vmatpush1.msra.mxu0 %v62_v3  ;;  %569 = vmatpush1.msra.mxu1 %v62_v3  ;;  %v53_v12 = vld [vmem:[%s941_s1 + $0x18] sm:$0xff]  ;;  %v52_v13 = vld [vmem:[%s941_s1 + $0x10] sm:$0xff]  ;;  %v51_v14 = vld [vmem:[%s941_s1 + $0x8] sm:$0xff] }
   0x6   :  { %195 = vmatprep.subr.mxu0 %v61_v4  ;;  %562 = vmatprep.subr.mxu1 %v61_v4  ;;  %v50_v15 = vld [vmem:[%s941_s1] sm:$0xff] }
   0x7   :  { %196 = vmatpush1.msra.mxu0 %v60_v5  ;;  %570 = vmatpush1.msra.mxu1 %v60_v5  ;;  %v18_v16 = vld [vmem:[%s940_s0] sm:$0xff] }
   0x8   :  { %197 = vmatprep.subr.mxu0 %v59_v6  ;;  %563 = vmatprep.subr.mxu1 %v59_v6  ;;  %v34_v17 = vld [vmem:[%s940_s0 + $0x80] sm:$0xff] }
   0x9   :  { %198 = vmatpush1.msra.mxu0 %v58_v7  ;;  %571 = vmatpush1.msra.mxu1 %v58_v7 }
   0xa   :  { %199 = vmatprep.subr.mxu0 %v57_v8  ;;  %564 = vmatprep.subr.mxu1 %v57_v8 }
   0xb   :  { %200 = vmatpush1.msra.mxu0 %v56_v9  ;;  %572 = vmatpush1.msra.mxu1 %v56_v9 }
   0xc   :  { %201 = vmatprep.subr.mxu0 %v55_v10  ;;  %565 = vmatprep.subr.mxu1 %v55_v10 }
   0xd   :  { %202 = vmatpush1.msra.mxu0 %v54_v11  ;;  %573 = vmatpush1.msra.mxu1 %v54_v11 }
   0xe   :  { %203 = vmatprep.subr.mxu0 %v53_v12  ;;  %566 = vmatprep.subr.mxu1 %v53_v12 }
   0xf   :  { %204 = vmatpush1.msra.mxu0 %v52_v13  ;;  %574 = vmatpush1.msra.mxu1 %v52_v13 }
  0x10   :  { %205 = vmatprep.subr.mxu0 %v51_v14  ;;  %567 = vmatprep.subr.mxu1 %v51_v14 }
  0x11   :  { %206 = vmatpush1.msra.mxu0 %v50_v15  ;;  %575 = vmatpush1.msra.mxu1 %v50_v15 }
  0x12   :  { %11 = vsyncpa [#allocation5], 0  ;;  %v625_v18 = vmov 0.0   ;;  %v19_v19 = vld [vmem:[%s940_s0 + $0x8] sm:$0xff]  ;;  %v20_v21 = vld [vmem:[%s940_s0 + $0x10] sm:$0xff]  ;;  %v68_v49 = vlaneseq  ;;  %s627_s6 = smov [#allocation4]  }
  0x13   :  { %239 = vmatprep.mubr.f32.mxu0 %v625_v18  ;;  %335 = vmatprep.mubr.f32.mxu1 %v625_v18  ;;  %v35_v20 = vld [vmem:[%s940_s0 + $0x88] sm:$0xff]  ;;  %v36_v22 = vld [vmem:[%s940_s0 + $0x90] sm:$0xff]  ;;  %v21_v23 = vld [vmem:[%s940_s0 + $0x18] sm:$0xff]  ;;  %s513_s7 = sshll.u32 %s627_s6, 4  ;;  %s514_s7 = int_to_ptr.vmem [resolvable:$true] %s513_s7 }
  0x14   :  { %528 = vmatmul.mubr.msk.f32.vlgmr.msra.gmra.mxu0 %vm78_vm0, %v18_v16  ;;  %544 = vmatmul.mubr.msk.f32.vlgmr.msra.gmra.mxu1 %vm78_vm0, %v34_v17  ;;  %v37_v24 = vld [vmem:[%s940_s0 + $0x98] sm:$0xff]  ;;  %v22_v25 = vld [vmem:[%s940_s0 + $0x20] sm:$0xff]  ;;  %v23_v27 = vld [vmem:[%s940_s0 + $0x28] sm:$0xff]  ;;  %v69_v50 = vshrl.u32 %v68_v49, 7 }
  0x15   :  { %245 = vmatprep.mubr.f32.mxu0 %v625_v18  ;;  %341 = vmatprep.mubr.f32.mxu1 %v625_v18  ;;  %v38_v26 = vld [vmem:[%s940_s0 + $0xa0] sm:$0xff]  ;;  %v39_v28 = vld [vmem:[%s940_s0 + $0xa8] sm:$0xff]  ;;  %v24_v29 = vld [vmem:[%s940_s0 + $0x30] sm:$0xff] }
  0x16   :  { %v40_v30 = vld [vmem:[%s940_s0 + $0xb0] sm:$0xff]  ;;  %v25_v31 = vld [vmem:[%s940_s0 + $0x38] sm:$0xff]  ;;  %v26_v33 = vld [vmem:[%s940_s0 + $0x40] sm:$0xff]  ;;  %v70_v51 = vsub.s32 0, %v69_v50  ;;  %v74_v53 = vsub.s32 1, %v69_v50 }
  0x17   :  { %v41_v32 = vld [vmem:[%s940_s0 + $0xb8] sm:$0xff]  ;;  %v42_v34 = vld [vmem:[%s940_s0 + $0xc0] sm:$0xff]  ;;  %v27_v35 = vld [vmem:[%s940_s0 + $0x48] sm:$0xff] }
  0x18   :  { %529 = vmatmul.mubr.msk.f32.gmra.mxu0 %vm78_vm0, %v19_v19  ;;  %545 = vmatmul.mubr.msk.f32.gmra.mxu1 %vm78_vm0, %v35_v20  ;;  %v43_v36 = vld [vmem:[%s940_s0 + $0xc8] sm:$0xff]  ;;  %v28_v37 = vld [vmem:[%s940_s0 + $0x50] sm:$0xff]  ;;  %v29_v39 = vld [vmem:[%s940_s0 + $0x58] sm:$0xff] }
  0x19   :  { %251 = vmatprep.mubr.f32.mxu0 %v625_v18  ;;  %347 = vmatprep.mubr.f32.mxu1 %v625_v18  ;;  %v44_v38 = vld [vmem:[%s940_s0 + $0xd0] sm:$0xff]  ;;  %v45_v40 = vld [vmem:[%s940_s0 + $0xd8] sm:$0xff]  ;;  %v30_v41 = vld [vmem:[%s940_s0 + $0x60] sm:$0xff] }
  0x1a   :  { %v46_v42 = vld [vmem:[%s940_s0 + $0xe0] sm:$0xff]  ;;  %v31_v43 = vld [vmem:[%s940_s0 + $0x68] sm:$0xff]  ;;  %v32_v45 = vld [vmem:[%s940_s0 + $0x70] sm:$0xff] }
  0x1b   :  { %v47_v44 = vld [vmem:[%s940_s0 + $0xe8] sm:$0xff]  ;;  %v48_v46 = vld [vmem:[%s940_s0 + $0xf0] sm:$0xff]  ;;  %v33_v47 = vld [vmem:[%s940_s0 + $0x78] sm:$0xff] }
  0x1c   :  { %530 = vmatmul.mubr.msk.f32.gmra.mxu0 %vm78_vm0, %v20_v21  ;;  %546 = vmatmul.mubr.msk.f32.gmra.mxu1 %vm78_vm0, %v36_v22  ;;  %v49_v48 = vld [vmem:[%s940_s0 + $0xf8] sm:$0xff]  ;;  %v66_v52 = vld [vmem:[%s942_s2] sm:$0x3]  ;;  %s626_s0 = smov [#allocation2]  }
  0x1d   :  { %257 = vmatprep.mubr.f32.mxu0 %v625_v18  ;;  %353 = vmatprep.mubr.f32.mxu1 %v625_v18  ;;  %v866_v54 = vrot.slane %v66_v52, %v70_v51  ;;  %v868_v55 = vrot.slane %v66_v52, %v74_v53  ;;  %s501_s2 = sshll.u32 %s626_s0, 4  ;;  %s502_s2 = int_to_ptr.vmem [resolvable:$true] %s501_s2 }
  0x1e   :  { %s581_s8 = scalar_lea.vmem %s502_s2, 4096  ;;  %p586_p1 = scmp.lt.s32.totalorder %s502_s2, %s502_s2 }
  0x1f   :  { %p582_p0 = scmp.ne.s32.totalorder %s502_s2, %s581_s8  ;;  %p587_p2 = scmp.lt.s32.totalorder %s581_s8, %s581_s8 }
  0x20   :  { %531 = vmatmul.mubr.msk.f32.gmra.mxu0 %vm78_vm0, %v21_v23  ;;  %547 = vmatmul.mubr.msk.f32.gmra.mxu1 %vm78_vm0, %v37_v24 }
  0x21   :  { %263 = vmatprep.mubr.f32.mxu0 %v625_v18  ;;  %359 = vmatprep.mubr.f32.mxu1 %v625_v18  ;;  %p588_p3 = por %p587_p2, %p586_p1 }
  0x23   :  { %p589_p4 = pnand %p588_p3, %p582_p0 }
  0x24   :  { %532 = vmatmul.mubr.msk.f32.gmra.mxu0 %vm78_vm0, %v22_v25  ;;  %548 = vmatmul.mubr.msk.f32.gmra.mxu1 %vm78_vm0, %v38_v26 }
  0x25   :  { %269 = vmatprep.mubr.f32.mxu0 %v625_v18  ;;  %365 = vmatprep.mubr.f32.mxu1 %v625_v18 }
  0x28   :  { %533 = vmatmul.mubr.msk.f32.gmra.mxu0 %vm78_vm0, %v23_v27  ;;  %549 = vmatmul.mubr.msk.f32.gmra.mxu1 %vm78_vm0, %v39_v28 }
  0x29   :  { %275 = vmatprep.mubr.f32.mxu0 %v625_v18  ;;  %371 = vmatprep.mubr.f32.mxu1 %v625_v18 }
  0x2c   :  { %534 = vmatmul.mubr.msk.f32.gmra.mxu0 %vm78_vm0, %v24_v29  ;;  %550 = vmatmul.mubr.msk.f32.gmra.mxu1 %vm78_vm0, %v40_v30 }
  0x2d   :  { %281 = vmatprep.mubr.f32.mxu0 %v625_v18  ;;  %377 = vmatprep.mubr.f32.mxu1 %v625_v18 }
  0x30   :  { %535 = vmatmul.mubr.msk.f32.gmra.mxu0 %vm78_vm0, %v25_v31  ;;  %551 = vmatmul.mubr.msk.f32.gmra.mxu1 %vm78_vm0, %v41_v32 }
  0x31   :  { %287 = vmatprep.mubr.f32.mxu0 %v625_v18  ;;  %383 = vmatprep.mubr.f32.mxu1 %v625_v18 }
  0x34   :  { %536 = vmatmul.mubr.msk.f32.gmra.mxu0 %vm78_vm0, %v26_v33  ;;  %552 = vmatmul.mubr.msk.f32.gmra.mxu1 %vm78_vm0, %v42_v34 }
  0x35   :  { %293 = vmatprep.mubr.f32.mxu0 %v625_v18  ;;  %389 = vmatprep.mubr.f32.mxu1 %v625_v18 }
  0x38   :  { %537 = vmatmul.mubr.msk.f32.gmra.mxu0 %vm78_vm0, %v27_v35  ;;  %553 = vmatmul.mubr.msk.f32.gmra.mxu1 %vm78_vm0, %v43_v36 }
  0x39   :  { %299 = vmatprep.mubr.f32.mxu0 %v625_v18  ;;  %395 = vmatprep.mubr.f32.mxu1 %v625_v18 }
  0x3c   :  { %538 = vmatmul.mubr.msk.f32.gmra.mxu0 %vm78_vm0, %v28_v37  ;;  %554 = vmatmul.mubr.msk.f32.gmra.mxu1 %vm78_vm0, %v44_v38 }
  0x3d   :  { %305 = vmatprep.mubr.f32.mxu0 %v625_v18  ;;  %401 = vmatprep.mubr.f32.mxu1 %v625_v18 }
  0x40   :  { %539 = vmatmul.mubr.msk.f32.gmra.mxu0 %vm78_vm0, %v29_v39  ;;  %555 = vmatmul.mubr.msk.f32.gmra.mxu1 %vm78_vm0, %v45_v40 }
  0x41   :  { %311 = vmatprep.mubr.f32.mxu0 %v625_v18  ;;  %407 = vmatprep.mubr.f32.mxu1 %v625_v18 }
  0x44   :  { %540 = vmatmul.mubr.msk.f32.gmra.mxu0 %vm78_vm0, %v30_v41  ;;  %556 = vmatmul.mubr.msk.f32.gmra.mxu1 %vm78_vm0, %v46_v42 }
  0x45   :  { %317 = vmatprep.mubr.f32.mxu0 %v625_v18  ;;  %413 = vmatprep.mubr.f32.mxu1 %v625_v18 }
  0x48   :  { %541 = vmatmul.mubr.msk.f32.gmra.mxu0 %vm78_vm0, %v31_v43  ;;  %557 = vmatmul.mubr.msk.f32.gmra.mxu1 %vm78_vm0, %v47_v44 }
  0x49   :  { %323 = vmatprep.mubr.f32.mxu0 %v625_v18  ;;  %419 = vmatprep.mubr.f32.mxu1 %v625_v18 }
  0x4c   :  { %542 = vmatmul.mubr.msk.f32.gmra.mxu0 %vm78_vm0, %v32_v45  ;;  %558 = vmatmul.mubr.msk.f32.gmra.mxu1 %vm78_vm0, %v48_v46 }
  0x4d   :  { %329 = vmatprep.mubr.f32.mxu0 %v625_v18  ;;  %425 = vmatprep.mubr.f32.mxu1 %v625_v18 }
  0x50   :  { %543 = vmatmul.mubr.msk.f32.gmra.mxu0 %vm78_vm0, %v33_v47  ;;  %559 = vmatmul.mubr.msk.f32.gmra.mxu1 %vm78_vm0, %v49_v48 }
  0xd4   :  { %v241_v56 = vpop.f32.mrf.mxu0  ;;  %v337_v57 = vpop.f32.mrf.mxu1 }
  0xd5   :  { %v242_v58 = vadd.f32 %v241_v56, %v866_v54  ;;  %v338_v59 = vadd.f32 %v337_v57, %v866_v54 }
  0xd6   :  { %v243_v60 = vpop.f32.mrf.mxu0  ;;  %v339_v61 = vpop.f32.mrf.mxu1 }
  0xd7   :  { %432 = vst [vmem:[#allocation2] sm:$0xff] %v242_v58  ;;  %448 = vst [vmem:[#allocation2 + $0x80] sm:$0xff] %v338_v59  ;;  %v244_v62 = vadd.f32 %v243_v60, %v868_v55  ;;  %v340_v63 = vadd.f32 %v339_v61, %v868_v55 }
  0xd8   :  { %v247_v0 = vpop.f32.mrf.mxu0  ;;  %v343_v1 = vpop.f32.mrf.mxu1 }
  0xd9   :  { %464 = vst [vmem:[#allocation4] sm:$0xff] %v244_v62  ;;  %480 = vst [vmem:[#allocation4 + $0x80] sm:$0xff] %v340_v63  ;;  %v248_v2 = vadd.f32 %v247_v0, %v866_v54  ;;  %v344_v3 = vadd.f32 %v343_v1, %v866_v54 }
  0xda   :  { %v249_v4 = vpop.f32.mrf.mxu0  ;;  %v345_v5 = vpop.f32.mrf.mxu1 }
  0xdb   :  { %433 = vst [vmem:[#allocation2 + $0x8] sm:$0xff] %v248_v2  ;;  %449 = vst [vmem:[#allocation2 + $0x88] sm:$0xff] %v344_v3  ;;  %v250_v6 = vadd.f32 %v249_v4, %v868_v55  ;;  %v346_v7 = vadd.f32 %v345_v5, %v868_v55 }
  0xdc   :  { %v253_v8 = vpop.f32.mrf.mxu0  ;;  %v349_v9 = vpop.f32.mrf.mxu1 }
  0xdd   :  { %465 = vst [vmem:[#allocation4 + $0x8] sm:$0xff] %v250_v6  ;;  %481 = vst [vmem:[#allocation4 + $0x88] sm:$0xff] %v346_v7  ;;  %v254_v10 = vadd.f32 %v253_v8, %v866_v54  ;;  %v350_v11 = vadd.f32 %v349_v9, %v866_v54 }
  0xde   :  { %v255_v12 = vpop.f32.mrf.mxu0  ;;  %v351_v13 = vpop.f32.mrf.mxu1 }
  0xdf   :  { %434 = vst [vmem:[#allocation2 + $0x10] sm:$0xff] %v254_v10  ;;  %450 = vst [vmem:[#allocation2 + $0x90] sm:$0xff] %v350_v11  ;;  %v256_v14 = vadd.f32 %v255_v12, %v868_v55  ;;  %v352_v15 = vadd.f32 %v351_v13, %v868_v55 }
  0xe0   :  { %v259_v16 = vpop.f32.mrf.mxu0  ;;  %v355_v17 = vpop.f32.mrf.mxu1 }
  0xe1   :  { %466 = vst [vmem:[#allocation4 + $0x10] sm:$0xff] %v256_v14  ;;  %482 = vst [vmem:[#allocation4 + $0x90] sm:$0xff] %v352_v15  ;;  %v260_v18 = vadd.f32 %v259_v16, %v866_v54  ;;  %v356_v19 = vadd.f32 %v355_v17, %v866_v54 }
  0xe2   :  { %v261_v20 = vpop.f32.mrf.mxu0  ;;  %v357_v21 = vpop.f32.mrf.mxu1 }
  0xe3   :  { %435 = vst [vmem:[#allocation2 + $0x18] sm:$0xff] %v260_v18  ;;  %451 = vst [vmem:[#allocation2 + $0x98] sm:$0xff] %v356_v19  ;;  %v262_v22 = vadd.f32 %v261_v20, %v868_v55  ;;  %v358_v23 = vadd.f32 %v357_v21, %v868_v55 }
  0xe4   :  { %v265_v24 = vpop.f32.mrf.mxu0  ;;  %v361_v25 = vpop.f32.mrf.mxu1 }
  0xe5   :  { %467 = vst [vmem:[#allocation4 + $0x18] sm:$0xff] %v262_v22  ;;  %483 = vst [vmem:[#allocation4 + $0x98] sm:$0xff] %v358_v23  ;;  %v266_v26 = vadd.f32 %v265_v24, %v866_v54  ;;  %v362_v27 = vadd.f32 %v361_v25, %v866_v54 }
  0xe6   :  { %v267_v28 = vpop.f32.mrf.mxu0  ;;  %v363_v29 = vpop.f32.mrf.mxu1 }
  0xe7   :  { %436 = vst [vmem:[#allocation2 + $0x20] sm:$0xff] %v266_v26  ;;  %452 = vst [vmem:[#allocation2 + $0xa0] sm:$0xff] %v362_v27  ;;  %v268_v30 = vadd.f32 %v267_v28, %v868_v55  ;;  %v364_v31 = vadd.f32 %v363_v29, %v868_v55 }
  0xe8   :  { %v271_v32 = vpop.f32.mrf.mxu0  ;;  %v367_v33 = vpop.f32.mrf.mxu1 }
  0xe9   :  { %468 = vst [vmem:[#allocation4 + $0x20] sm:$0xff] %v268_v30  ;;  %484 = vst [vmem:[#allocation4 + $0xa0] sm:$0xff] %v364_v31  ;;  %v272_v34 = vadd.f32 %v271_v32, %v866_v54  ;;  %v368_v35 = vadd.f32 %v367_v33, %v866_v54 }
  0xea   :  { %v273_v36 = vpop.f32.mrf.mxu0  ;;  %v369_v37 = vpop.f32.mrf.mxu1 }
  0xeb   :  { %437 = vst [vmem:[#allocation2 + $0x28] sm:$0xff] %v272_v34  ;;  %453 = vst [vmem:[#allocation2 + $0xa8] sm:$0xff] %v368_v35  ;;  %v274_v38 = vadd.f32 %v273_v36, %v868_v55  ;;  %v370_v39 = vadd.f32 %v369_v37, %v868_v55 }
  0xec   :  { %v277_v40 = vpop.f32.mrf.mxu0  ;;  %v373_v41 = vpop.f32.mrf.mxu1 }
  0xed   :  { %469 = vst [vmem:[#allocation4 + $0x28] sm:$0xff] %v274_v38  ;;  %485 = vst [vmem:[#allocation4 + $0xa8] sm:$0xff] %v370_v39  ;;  %v278_v42 = vadd.f32 %v277_v40, %v866_v54  ;;  %v374_v43 = vadd.f32 %v373_v41, %v866_v54 }
  0xee   :  { %v279_v44 = vpop.f32.mrf.mxu0  ;;  %v375_v45 = vpop.f32.mrf.mxu1 }
  0xef   :  { %438 = vst [vmem:[#allocation2 + $0x30] sm:$0xff] %v278_v42  ;;  %454 = vst [vmem:[#allocation2 + $0xb0] sm:$0xff] %v374_v43  ;;  %v280_v46 = vadd.f32 %v279_v44, %v868_v55  ;;  %v376_v47 = vadd.f32 %v375_v45, %v868_v55 }
  0xf0   :  { %v283_v48 = vpop.f32.mrf.mxu0  ;;  %v379_v49 = vpop.f32.mrf.mxu1 }
  0xf1   :  { %470 = vst [vmem:[#allocation4 + $0x30] sm:$0xff] %v280_v46  ;;  %486 = vst [vmem:[#allocation4 + $0xb0] sm:$0xff] %v376_v47  ;;  %v284_v50 = vadd.f32 %v283_v48, %v866_v54  ;;  %v380_v51 = vadd.f32 %v379_v49, %v866_v54 }
  0xf2   :  { %v285_v52 = vpop.f32.mrf.mxu0  ;;  %v381_v53 = vpop.f32.mrf.mxu1 }
  0xf3   :  { %439 = vst [vmem:[#allocation2 + $0x38] sm:$0xff] %v284_v50  ;;  %455 = vst [vmem:[#allocation2 + $0xb8] sm:$0xff] %v380_v51  ;;  %v286_v56 = vadd.f32 %v285_v52, %v868_v55  ;;  %v382_v57 = vadd.f32 %v381_v53, %v868_v55 }
  0xf4   :  { %v289_v58 = vpop.f32.mrf.mxu0  ;;  %v385_v59 = vpop.f32.mrf.mxu1 }
  0xf5   :  { %471 = vst [vmem:[#allocation4 + $0x38] sm:$0xff] %v286_v56  ;;  %487 = vst [vmem:[#allocation4 + $0xb8] sm:$0xff] %v382_v57  ;;  %v290_v60 = vadd.f32 %v289_v58, %v866_v54  ;;  %v386_v61 = vadd.f32 %v385_v59, %v866_v54 }
  0xf6   :  { %v291_v62 = vpop.f32.mrf.mxu0  ;;  %v387_v63 = vpop.f32.mrf.mxu1 }
  0xf7   :  { %440 = vst [vmem:[#allocation2 + $0x40] sm:$0xff] %v290_v60  ;;  %456 = vst [vmem:[#allocation2 + $0xc0] sm:$0xff] %v386_v61  ;;  %v292_v0 = vadd.f32 %v291_v62, %v868_v55  ;;  %v388_v1 = vadd.f32 %v387_v63, %v868_v55 }
  0xf8   :  { %v295_v2 = vpop.f32.mrf.mxu0  ;;  %v391_v3 = vpop.f32.mrf.mxu1 }
  0xf9   :  { %472 = vst [vmem:[#allocation4 + $0x40] sm:$0xff] %v292_v0  ;;  %488 = vst [vmem:[#allocation4 + $0xc0] sm:$0xff] %v388_v1  ;;  %v296_v4 = vadd.f32 %v295_v2, %v866_v54  ;;  %v392_v5 = vadd.f32 %v391_v3, %v866_v54 }
  0xfa   :  { %v297_v6 = vpop.f32.mrf.mxu0  ;;  %v393_v7 = vpop.f32.mrf.mxu1 }
  0xfb   :  { %441 = vst [vmem:[#allocation2 + $0x48] sm:$0xff] %v296_v4  ;;  %457 = vst [vmem:[#allocation2 + $0xc8] sm:$0xff] %v392_v5  ;;  %v298_v8 = vadd.f32 %v297_v6, %v868_v55  ;;  %v394_v9 = vadd.f32 %v393_v7, %v868_v55 }
  0xfc   :  { %v301_v10 = vpop.f32.mrf.mxu0  ;;  %v397_v11 = vpop.f32.mrf.mxu1 }
  0xfd   :  { %473 = vst [vmem:[#allocation4 + $0x48] sm:$0xff] %v298_v8  ;;  %489 = vst [vmem:[#allocation4 + $0xc8] sm:$0xff] %v394_v9  ;;  %v302_v12 = vadd.f32 %v301_v10, %v866_v54  ;;  %v398_v13 = vadd.f32 %v397_v11, %v866_v54 }
  0xfe   :  { %v303_v14 = vpop.f32.mrf.mxu0  ;;  %v399_v15 = vpop.f32.mrf.mxu1 }
  0xff   :  { %442 = vst [vmem:[#allocation2 + $0x50] sm:$0xff] %v302_v12  ;;  %458 = vst [vmem:[#allocation2 + $0xd0] sm:$0xff] %v398_v13  ;;  %v304_v16 = vadd.f32 %v303_v14, %v868_v55  ;;  %v400_v17 = vadd.f32 %v399_v15, %v868_v55 }
 0x100   :  { %v307_v18 = vpop.f32.mrf.mxu0  ;;  %v403_v19 = vpop.f32.mrf.mxu1 }
 0x101   :  { %474 = vst [vmem:[#allocation4 + $0x50] sm:$0xff] %v304_v16  ;;  %490 = vst [vmem:[#allocation4 + $0xd0] sm:$0xff] %v400_v17  ;;  %v308_v20 = vadd.f32 %v307_v18, %v866_v54  ;;  %v404_v21 = vadd.f32 %v403_v19, %v866_v54 }
 0x102   :  { %v309_v22 = vpop.f32.mrf.mxu0  ;;  %v405_v23 = vpop.f32.mrf.mxu1 }
 0x103   :  { %443 = vst [vmem:[#allocation2 + $0x58] sm:$0xff] %v308_v20  ;;  %459 = vst [vmem:[#allocation2 + $0xd8] sm:$0xff] %v404_v21  ;;  %v310_v24 = vadd.f32 %v309_v22, %v868_v55  ;;  %v406_v25 = vadd.f32 %v405_v23, %v868_v55 }
 0x104   :  { %v313_v26 = vpop.f32.mrf.mxu0  ;;  %v409_v27 = vpop.f32.mrf.mxu1 }
 0x105   :  { %475 = vst [vmem:[#allocation4 + $0x58] sm:$0xff] %v310_v24  ;;  %491 = vst [vmem:[#allocation4 + $0xd8] sm:$0xff] %v406_v25  ;;  %v314_v28 = vadd.f32 %v313_v26, %v866_v54  ;;  %v410_v29 = vadd.f32 %v409_v27, %v866_v54 }
 0x106   :  { %v315_v30 = vpop.f32.mrf.mxu0  ;;  %v411_v31 = vpop.f32.mrf.mxu1 }
 0x107   :  { %444 = vst [vmem:[#allocation2 + $0x60] sm:$0xff] %v314_v28  ;;  %460 = vst [vmem:[#allocation2 + $0xe0] sm:$0xff] %v410_v29  ;;  %v316_v32 = vadd.f32 %v315_v30, %v868_v55  ;;  %v412_v33 = vadd.f32 %v411_v31, %v868_v55 }
 0x108   :  { %v319_v34 = vpop.f32.mrf.mxu0  ;;  %v415_v35 = vpop.f32.mrf.mxu1 }
 0x109   :  { %476 = vst [vmem:[#allocation4 + $0x60] sm:$0xff] %v316_v32  ;;  %492 = vst [vmem:[#allocation4 + $0xe0] sm:$0xff] %v412_v33  ;;  %v320_v36 = vadd.f32 %v319_v34, %v866_v54  ;;  %v416_v37 = vadd.f32 %v415_v35, %v866_v54 }
 0x10a   :  { %v321_v38 = vpop.f32.mrf.mxu0  ;;  %v417_v39 = vpop.f32.mrf.mxu1 }
 0x10b   :  { %445 = vst [vmem:[#allocation2 + $0x68] sm:$0xff] %v320_v36  ;;  %461 = vst [vmem:[#allocation2 + $0xe8] sm:$0xff] %v416_v37  ;;  %v322_v40 = vadd.f32 %v321_v38, %v868_v55  ;;  %v418_v41 = vadd.f32 %v417_v39, %v868_v55 }
 0x10c   :  { %v325_v42 = vpop.f32.mrf.mxu0  ;;  %v421_v43 = vpop.f32.mrf.mxu1 }
 0x10d   :  { %477 = vst [vmem:[#allocation4 + $0x68] sm:$0xff] %v322_v40  ;;  %493 = vst [vmem:[#allocation4 + $0xe8] sm:$0xff] %v418_v41  ;;  %v326_v44 = vadd.f32 %v325_v42, %v866_v54  ;;  %v422_v45 = vadd.f32 %v421_v43, %v866_v54 }
 0x10e   :  { %v327_v46 = vpop.f32.mrf.mxu0  ;;  %v423_v47 = vpop.f32.mrf.mxu1 }
 0x10f   :  { %446 = vst [vmem:[#allocation2 + $0x70] sm:$0xff] %v326_v44  ;;  %462 = vst [vmem:[#allocation2 + $0xf0] sm:$0xff] %v422_v45  ;;  %v328_v48 = vadd.f32 %v327_v46, %v868_v55  ;;  %v424_v49 = vadd.f32 %v423_v47, %v868_v55 }
 0x110   :  { %v331_v50 = vpop.f32.mrf.mxu0  ;;  %v427_v51 = vpop.f32.mrf.mxu1 }
 0x111   :  { %478 = vst [vmem:[#allocation4 + $0x70] sm:$0xff] %v328_v48  ;;  %494 = vst [vmem:[#allocation4 + $0xf0] sm:$0xff] %v424_v49  ;;  %v332_v52 = vadd.f32 %v331_v50, %v866_v54  ;;  %v428_v53 = vadd.f32 %v427_v51, %v866_v54 }
 0x112   :  { %v333_v56 = vpop.f32.mrf.mxu0  ;;  %v429_v57 = vpop.f32.mrf.mxu1 }
 0x113   :  { %447 = vst [vmem:[#allocation2 + $0x78] sm:$0xff] %v332_v52  ;;  %463 = vst [vmem:[#allocation2 + $0xf8] sm:$0xff] %v428_v53  ;;  %v334_v58 = vadd.f32 %v333_v56, %v868_v55  ;;  %v430_v59 = vadd.f32 %v429_v57, %v868_v55 }
 0x114   :  { %592 = shalt.err (!%p589_p4)
}
 0x115   :  { %s628_s9 = smov 128   ;;  %s629_s10 = smov 8   ;;  %479 = vst [vmem:[#allocation4 + $0x78] sm:$0xff] %v334_v58  ;;  %495 = vst [vmem:[#allocation4 + $0xf8] sm:$0xff] %v430_v59 }
 0x116   :  { %507 = dma.vmem_to_hbm [thread:$0]  %s502_s2, 4096, %s943_s3, [#allocation3], %s628_s9, %s628_s9, %s629_s10  }
 0x117   :  { %s601_s13 = scalar_lea.vmem %s514_s7, 4096  ;;  %p606_p6 = scmp.lt.s32.totalorder %s514_s7, %s514_s7 }
 0x118   :  { %p602_p5 = scmp.ne.s32.totalorder %s514_s7, %s601_s13  ;;  %p607_p7 = scmp.lt.s32.totalorder %s601_s13, %s601_s13 }
 0x11a   :  { %p608_p8 = por %p607_p7, %p606_p6 }
 0x11c   :  { %p609_p9 = pnand %p608_p8, %p602_p5 }
 0x11e   :  { %612 = shalt.err (!%p609_p9)
}
 0x11f   :  { %519 = dma.vmem_to_hbm [thread:$0]  %s514_s7, 4096, %s944_s4, [#allocation5], %s628_s9, %s628_s9, %s629_s10  }
 0x120   :  { %621 = dma.done.wait [#allocation3], 4096  }
 0x121   :  { %622 = vsyncadd [#allocation3], 4294963200 }
 0x122   :  { %623 = dma.done.wait [#allocation5], 4096  }
 0x123   :  { %624 = vsyncadd [#allocation5], 4294963200 }
 0x124   :  { %526 = vsyncpa [#allocation3], 1 }
 0x125   :  { %527 = vsyncpa [#allocation5], 1 }

</bundles_post_ra>
